<compile_context>
chip_gen: v5e
topology: v5e:2x2
jax: 0.10.0
libtpu: 0.0.40
codegen_flags: <defaults>
</compile_context>

<pallas_src>
import math

import jax
import jax.numpy as jnp
from jax.experimental import pallas as pl
from jax.experimental.pallas import tpu as pltpu


# Sublane tile height per itemsize (f32 / bf16 / int8).
_SUBLANE = {4: 8, 2: 16, 1: 32}

_BLOCK_BYTES_TARGET = 4 * 1024 * 1024  # tiled (in + out) bytes per grid step


def to_2tuple(x):
    if isinstance(x, (tuple, list)):
        return tuple(x)
    return (x, x)


def _cdiv(a, b):
    return -(-a // b)


def _round_up(x, m):
    return _cdiv(x, m) * m


_VMEM_LIMIT_CACHE = None


def _pick_vmem_limit():
    """Derive vmem_limit_bytes from the actual chip (v7x: 64 MiB/TC)."""
    global _VMEM_LIMIT_CACHE
    if _VMEM_LIMIT_CACHE is None:
        cap = 64 * 1024 * 1024  # conservative default = v7x per-TC capacity
        try:
            c = int(pltpu.get_tpu_info().vmem_capacity_bytes)
            if c > 0:
                cap = c
        except Exception:
            pass
        _VMEM_LIMIT_CACHE = max(32 * 1024 * 1024,
                                min(3 * cap // 4, 96 * 1024 * 1024))
    return _VMEM_LIMIT_CACHE


def _choose_channel_block(nc, per_channel_tiled_bytes, align,
                          target_bytes=_BLOCK_BYTES_TARGET, min_steps=8):
    """Pick the fused-channel block size CB.

    - CB * per_channel_tiled_bytes <= target_bytes (~1-4 MiB class blocks)
    - >= min_steps grid steps when nc allows (>= 4 steps per v7x TensorCore)
    - CB is a multiple of `align` (sublane tile) or equal to nc, so 2-D flat
      blocks respect the (sublane, 128) BlockSpec constraint
    - best effort: an even number of grid steps (v7x dual-TC load balance)
    """
    cb = max(1, target_bytes // max(1, per_channel_tiled_bytes))
    if nc >= min_steps:
        cb = min(cb, max(1, nc // min_steps))
    cb = min(cb, nc)
    if align > 1:
        if cb >= nc:
            return nc
        cb = max(align, (cb // align) * align)
        if cb >= nc:
            return nc

    step = align if align > 1 else 1

    def n_steps(c):
        return _cdiv(nc, c)

    if n_steps(cb) % 2 == 1 and cb > step:
        tried = 0
        for cand in range(cb - step, 0, -step):
            if n_steps(cand) % 2 == 0:
                return cand
            tried += 1
            if tried >= 8:
                break
    return cb


class AdaptivePaddingPallas:
    """Pallas/JAX port of AdaptivePadding (documented torch semantics)."""

    def __init__(self, kernel_size=1, stride=1, dilation=1, padding="corner"):
        if padding not in ("same", "corner"):
            raise ValueError(
                f"padding mode only support 'same' and 'corner', but got {padding}"
            )
        if stride is None:
            stride = kernel_size
        self.padding = padding
        self.kernel_size = to_2tuple(kernel_size)
        self.stride = to_2tuple(stride)
        self.dilation = to_2tuple(dilation)

    def get_pad_shape(self, input_shape):
        input_h, input_w = input_shape
        kernel_h, kernel_w = self.kernel_size
        stride_h, stride_w = self.stride
        output_h = math.ceil(input_h / stride_h)
        output_w = math.ceil(input_w / stride_w)
        pad_h = max(
            (output_h - 1) * stride_h + (kernel_h - 1) * self.dilation[0] + 1 - input_h,
            0,
        )
        pad_w = max(
            (output_w - 1) * stride_w + (kernel_w - 1) * self.dilation[1] + 1 - input_w,
            0,
        )
        return pad_h, pad_w

    def __call__(self, x):
        # x: (N, C, H, W)
        N, C, H, W = x.shape
        pad_h, pad_w = self.get_pad_shape((H, W))
        if pad_h == 0 and pad_w == 0:
            return x  # matches the torch early-exit (no padding applied)

        if self.padding == "corner":
            pad_top, pad_left = 0, 0
        else:  # "same" — asymmetric split (floor // 2 on top/left)
            pad_top, pad_left = pad_h // 2, pad_w // 2
        pad_bottom = pad_h - pad_top
        pad_right = pad_w - pad_left

        H_out = H + pad_h
        W_out = W + pad_w
        NC = N * C
        dtype = x.dtype
        itemsize = jnp.dtype(dtype).itemsize
        sub = _SUBLANE.get(itemsize, 8)

        cost = pl.CostEstimate(
            flops=0,
            transcendentals=0,
            bytes_accessed=int(NC * (H * W + H_out * W_out) * itemsize),
        )
        cparams = pltpu.CompilerParams(
            dimension_semantics=("parallel",),
            vmem_limit_bytes=_pick_vmem_limit(),
        )

        # Lane-dense flat path for small spatial maps (W_out < 128): both the
        # load and the single store are over flattened (H*W / H_out*W_out) lane
        # dims.  Fall back to the structured 3-D path when W_out is already
        # lane-dense or when per-row unrolled assembly would get too large.
        use_flat = (W_out < 128) and (pad_w == 0 or H <= 64)

        if use_flat:
            HW, HoWo = H * W, H_out * W_out
            # (sublane,128)-tile-corrected bytes per channel (in + out).
            per_ch = (_round_up(HW, 128) + _round_up(HoWo, 128)) * itemsize
            CB = _choose_channel_block(NC, per_ch, align=sub)
            grid = (_cdiv(NC, CB),)

            def flat_pad_kernel(x_ref, o_ref):
                pieces = []
                if pad_top:
                    pieces.append(jnp.zeros((CB, pad_top * W_out), dtype))
                if pad_w == 0:
                    pieces.append(x_ref[...])
                else:
                    zl = jnp.zeros((CB, pad_left), dtype) if pad_left else None
                    zr = jnp.zeros((CB, pad_right), dtype) if pad_right else None
                    for h in range(H):
                        if pad_left:
                            pieces.append(zl)
                        pieces.append(x_ref[:, h * W:(h + 1) * W])
                        if pad_right:
                            pieces.append(zr)
                if pad_bottom:
                    pieces.append(jnp.zeros((CB, pad_bottom * W_out), dtype))
                out = pieces[0] if len(pieces) == 1 else jnp.concatenate(pieces, axis=-1)
                o_ref[...] = out  # one lane-dense full-tile store

            out_flat = pl.pallas_call(
                flat_pad_kernel,
                out_shape=jax.ShapeDtypeStruct((NC, HoWo), dtype),
                grid_spec=pltpu.PrefetchScalarGridSpec(
                    num_scalar_prefetch=0,
                    grid=grid,
                    in_specs=[pl.BlockSpec((CB, HW), lambda i: (i, 0))],
                    out_specs=pl.BlockSpec((CB, HoWo), lambda i: (i, 0)),
                ),
                compiler_params=cparams,
                cost_estimate=cost,
            )(x.reshape(NC, HW))
            return out_flat.reshape(N, C, H_out, W_out)

        # Structured 3-D path (W_out >= 128, or very tall maps with W padding).
        per_ch = (
            _round_up(H, sub) * _round_up(W, 128)
            + _round_up(H_out, sub) * _round_up(W_out, 128)
        ) * itemsize
        CB = _choose_channel_block(NC, per_ch, align=1)
        grid = (_cdiv(NC, CB),)

        def pad3d_kernel(x_ref, o_ref):
            blk = x_ref[...]  # (CB, H, W)
            if pad_w:
                parts = []
                if pad_left:
                    parts.append(jnp.zeros((CB, H, pad_left), dtype))
                parts.append(blk)
                if pad_right:
                    parts.append(jnp.zeros((CB, H, pad_right), dtype))
                blk = jnp.concatenate(parts, axis=-1)  # (CB, H, W_out)
            if pad_h:
                parts = []
                if pad_top:
                    parts.append(jnp.zeros((CB, pad_top, W_out), dtype))
                parts.append(blk)
                if pad_bottom:
                    parts.append(jnp.zeros((CB, pad_bottom, W_out), dtype))
                blk = jnp.concatenate(parts, axis=1)  # (CB, H_out, W_out)
            o_ref[...] = blk  # single full-tile store

        out3d = pl.pallas_call(
            pad3d_kernel,
            out_shape=jax.ShapeDtypeStruct((NC, H_out, W_out), dtype),
            grid_spec=pltpu.PrefetchScalarGridSpec(
                num_scalar_prefetch=0,
                grid=grid,
                in_specs=[pl.BlockSpec((CB, H, W), lambda i: (i, 0, 0))],
                out_specs=pl.BlockSpec((CB, H_out, W_out), lambda i: (i, 0, 0)),
            ),
            compiler_params=cparams,
            cost_estimate=cost,
        )(x.reshape(NC, H, W))
        return out3d.reshape(N, C, H_out, W_out)


def _reference_pad(x, module):
    """Pure-JAX reference matching the documented torch semantics."""
    H, W = x.shape[-2:]
    pad_h, pad_w = module.get_pad_shape((H, W))
    if pad_h == 0 and pad_w == 0:
        return x
    if module.padding == "corner":
        pads = ((0, 0), (0, 0), (0, pad_h), (0, pad_w))
    else:
        pads = (
            (0, 0),
            (0, 0),
            (pad_h // 2, pad_h - pad_h // 2),
            (pad_w // 2, pad_w - pad_w // 2),
        )
    return jnp.pad(x, pads)


if __name__ == "__main__":
    key = jax.random.PRNGKey(0)
    kx, k2 = jax.random.split(key)
    x = jax.random.normal(kx, (2, 4, 16, 16), dtype=jnp.float32)

    # kernel_size=7, stride=4 on H=W=16 -> pad_h = pad_w = 3 (nontrivial).
    corner_mod = AdaptivePaddingPallas(kernel_size=7, stride=4, dilation=1, padding="corner")
    same_mod = AdaptivePaddingPallas(kernel_size=7, stride=4, dilation=1, padding="same")

    y_corner = corner_mod(x)
    y_same = same_mod(x)
    jax.block_until_ready((y_corner, y_same))

    ref_corner = _reference_pad(x, corner_mod)
    ref_same = _reference_pad(x, same_mod)
    assert y_corner.shape == (2, 4, 19, 19), y_corner.shape
    assert y_same.shape == (2, 4, 19, 19), y_same.shape
    assert jnp.array_equal(y_corner, ref_corner), "corner-mode mismatch"
    assert jnp.array_equal(y_same, ref_same), "same-mode mismatch"

    # bf16 exercises the 16-sublane packing / alignment path (still exact).
    xb = x.astype(jnp.bfloat16)
    yb = jax.block_until_ready(corner_mod(xb))
    assert jnp.array_equal(yb, _reference_pad(xb, corner_mod)), "bf16 mismatch"

    # Wide feature map -> structured 3-D path (W_out >= 128).
    x2 = jax.random.normal(k2, (1, 2, 128, 128), dtype=jnp.float32)
    y2 = jax.block_until_ready(corner_mod(x2))
    assert y2.shape == (1, 2, 131, 131), y2.shape
    assert jnp.array_equal(y2, _reference_pad(x2, corner_mod)), "wide-map mismatch"

    # No-pad path (kernel_size=1, stride=1): identity, no kernel launched.
    ident_mod = AdaptivePaddingPallas(kernel_size=1, stride=1)
    y_ident = jax.block_until_ready(ident_mod(x))
    assert jnp.array_equal(y_ident, x)

    print("KERNEL_OK")
</pallas_src>

<mosaic_0001>
module attributes {stable_mosaic.version = 11 : i64} {
  func.func @flat_pad_kernel(%arg0: i32, %arg1: memref<8x256xf32, #tpu.memory_space<vmem>>, %arg2: memref<8x361xf32, #tpu.memory_space<vmem>>) attributes {dimension_semantics = [#tpu.dimension_semantics<parallel>], iteration_bounds = array<i64: 1>, scalar_prefetch = 0 : i64, scratch_operands = 0 : i64, tpu.core_type = #tpu.core_type<tc>, window_params = [{transform_indices = @transform_0, window_bounds = array<i64: 8, 256>}, {transform_indices = @transform_1, window_bounds = array<i64: 8, 361>}]} {
    %cst = arith.constant 0.000000e+00 : f32
    %0 = vector.broadcast %cst : f32 to vector<8x3xf32>
    %c0 = arith.constant 0 : index
    %c0_0 = arith.constant 0 : index
    %1 = vector.load %arg1[%c0, %c0_0] : memref<8x256xf32, #tpu.memory_space<vmem>>, vector<8x16xf32>
    %c0_1 = arith.constant 0 : index
    %c16 = arith.constant 16 : index
    %2 = vector.load %arg1[%c0_1, %c16] : memref<8x256xf32, #tpu.memory_space<vmem>>, vector<8x16xf32>
    %c0_2 = arith.constant 0 : index
    %c32 = arith.constant 32 : index
    %3 = vector.load %arg1[%c0_2, %c32] : memref<8x256xf32, #tpu.memory_space<vmem>>, vector<8x16xf32>
    %c0_3 = arith.constant 0 : index
    %c48 = arith.constant 48 : index
    %4 = vector.load %arg1[%c0_3, %c48] : memref<8x256xf32, #tpu.memory_space<vmem>>, vector<8x16xf32>
    %c0_4 = arith.constant 0 : index
    %c64 = arith.constant 64 : index
    %5 = vector.load %arg1[%c0_4, %c64] : memref<8x256xf32, #tpu.memory_space<vmem>>, vector<8x16xf32>
    %c0_5 = arith.constant 0 : index
    %c80 = arith.constant 80 : index
    %6 = vector.load %arg1[%c0_5, %c80] : memref<8x256xf32, #tpu.memory_space<vmem>>, vector<8x16xf32>
    %c0_6 = arith.constant 0 : index
    %c96 = arith.constant 96 : index
    %7 = vector.load %arg1[%c0_6, %c96] : memref<8x256xf32, #tpu.memory_space<vmem>>, vector<8x16xf32>
    %c0_7 = arith.constant 0 : index
    %c112 = arith.constant 112 : index
    %8 = vector.load %arg1[%c0_7, %c112] : memref<8x256xf32, #tpu.memory_space<vmem>>, vector<8x16xf32>
    %c0_8 = arith.constant 0 : index
    %c128 = arith.constant 128 : index
    %9 = vector.load %arg1[%c0_8, %c128] : memref<8x256xf32, #tpu.memory_space<vmem>>, vector<8x16xf32>
    %c0_9 = arith.constant 0 : index
    %c144 = arith.constant 144 : index
    %10 = vector.load %arg1[%c0_9, %c144] : memref<8x256xf32, #tpu.memory_space<vmem>>, vector<8x16xf32>
    %c0_10 = arith.constant 0 : index
    %c160 = arith.constant 160 : index
    %11 = vector.load %arg1[%c0_10, %c160] : memref<8x256xf32, #tpu.memory_space<vmem>>, vector<8x16xf32>
    %c0_11 = arith.constant 0 : index
    %c176 = arith.constant 176 : index
    %12 = vector.load %arg1[%c0_11, %c176] : memref<8x256xf32, #tpu.memory_space<vmem>>, vector<8x16xf32>
    %c0_12 = arith.constant 0 : index
    %c192 = arith.constant 192 : index
    %13 = vector.load %arg1[%c0_12, %c192] : memref<8x256xf32, #tpu.memory_space<vmem>>, vector<8x16xf32>
    %c0_13 = arith.constant 0 : index
    %c208 = arith.constant 208 : index
    %14 = vector.load %arg1[%c0_13, %c208] : memref<8x256xf32, #tpu.memory_space<vmem>>, vector<8x16xf32>
    %c0_14 = arith.constant 0 : index
    %c224 = arith.constant 224 : index
    %15 = vector.load %arg1[%c0_14, %c224] : memref<8x256xf32, #tpu.memory_space<vmem>>, vector<8x16xf32>
    %c0_15 = arith.constant 0 : index
    %c240 = arith.constant 240 : index
    %16 = vector.load %arg1[%c0_15, %c240] : memref<8x256xf32, #tpu.memory_space<vmem>>, vector<8x16xf32>
    %cst_16 = arith.constant 0.000000e+00 : f32
    %17 = vector.broadcast %cst_16 : f32 to vector<8x57xf32>
    %18 = tpu.concatenate %1, %0, %2, %0, %3, %0, %4, %0, %5, %0, %6, %0, %7, %0, %8, %0 in 1 : vector<8x16xf32>, vector<8x3xf32>, vector<8x16xf32>, vector<8x3xf32>, vector<8x16xf32>, vector<8x3xf32>, vector<8x16xf32>, vector<8x3xf32>, vector<8x16xf32>, vector<8x3xf32>, vector<8x16xf32>, vector<8x3xf32>, vector<8x16xf32>, vector<8x3xf32>, vector<8x16xf32>, vector<8x3xf32> -> vector<8x152xf32>
    %19 = tpu.concatenate %9, %0, %10, %0, %11, %0, %12, %0, %13, %0, %14, %0, %15, %0, %16, %0 in 1 : vector<8x16xf32>, vector<8x3xf32>, vector<8x16xf32>, vector<8x3xf32>, vector<8x16xf32>, vector<8x3xf32>, vector<8x16xf32>, vector<8x3xf32>, vector<8x16xf32>, vector<8x3xf32>, vector<8x16xf32>, vector<8x3xf32>, vector<8x16xf32>, vector<8x3xf32>, vector<8x16xf32>, vector<8x3xf32> -> vector<8x152xf32>
    %20 = tpu.concatenate %18, %19, %17 in 1 : vector<8x152xf32>, vector<8x152xf32>, vector<8x57xf32> -> vector<8x361xf32>
    %c0_17 = arith.constant 0 : index
    %c0_18 = arith.constant 0 : index
    %21 = vector.load %arg2[%c0_17, %c0_18] : memref<8x361xf32, #tpu.memory_space<vmem>>, vector<8x361xf32>
    tpu.vector_store %arg2[%c0_17, %c0_18], %20 {strides = array<i32>} : memref<8x361xf32, #tpu.memory_space<vmem>>, vector<8x361xf32>,
    return
  }
  func.func @transform_0(%arg0: i32) -> (i32, i32) {
    %c0_i32 = arith.constant 0 : i32
    %c0_i32_0 = arith.constant 0 : i32
    return %arg0, %c0_i32 : i32, i32
  }
  func.func @transform_1(%arg0: i32) -> (i32, i32) {
    %c0_i32 = arith.constant 0 : i32
    %c0_i32_0 = arith.constant 0 : i32
    return %arg0, %c0_i32 : i32, i32
  }
}

</mosaic_0001>

<bundles_post_ra>
// kernel: tpu_custom_call.1
= control target key start
LH: loop header
LB: loop body
LE: loop exit
PB: predicated region body
PF: predicated region fallthrough
CT: control target
= control target key end

     0   :  { %6 = vsyncpa [#allocation3], 0  ;;  %s266_s0 = inlined_call_operand.hbm [shape: f32[8,256], index: 0, kind: input, shape index: {}]   ;;  %s267_s1 = inlined_call_operand.hbm [shape: f32[8,361], index: 1, kind: output, shape index: {}]  }
   0x1   :  { %7 = vsyncpa [#allocation4], 0  ;;  %s13_s8 = sshll.u32 %s266_s0, 4  ;;  %s210_s9 = smov [#allocation2]   ;;  %s14_s8 = int_to_ptr.hbm [resolvable:$true] %s13_s8 }
   0x2   :  { %s15_s10 = sshll.u32 %s210_s9, 4  ;;  %s16_s10 = int_to_ptr.vmem [resolvable:$true] %s15_s10 }
   0x3   :  { %18 = dma.hbm_to_vmem [thread:$0]  %s14_s8, 256, %s16_s10, [#allocation3]  }
   0x4   :  { %206 = dma.done.wait [#allocation3], 256  }
   0x5   :  { %207 = vsyncadd [#allocation3], 4294967040  ;;  %v24_v0 = vld [vmem:[#allocation2 + $0x8] sm:$0xff]  ;;  %s211_s11 = smov 3   ;;  %s212_s12 = smov 9   ;;  %v23_v1 = vld [vmem:[#allocation2] sm:$0xff] }
   0x6   :  { %78 = vrot.lane.b32.xlu0 %v24_v0, %s211_s11  ;;  %84 = vrot.lane.b32.xlu1 %v24_v0, %s212_s12  ;;  %s213_s13 = smov 15   ;;  %s214_s14 = smov 6   ;;  %vm47_vm0 = vcmask 130048   ;;  %vm49_vm1 = vcmask 154624   ;;  %vm51_vm2 = vcmask 285696   ;;  %vm53_vm3 = vcmask 310272  }
   0x7   :  { %90 = vrot.lane.b32.xlu2 %v24_v0, %s213_s13  ;;  %s215_s15 = smov 12   ;;  %s216_s16 = smov 18   ;;  %v99_v5 = vsel %vm47_vm0, %v24_v0, 0.0  ;;  %vm55_vm4 = vcmask 441344   ;;  %vm57_vm5 = vcmask 465920   ;;  %vm59_vm6 = vcmask 596992  }
   0x8   :  { %s217_s0 = smov 21   ;;  %vm61_vm7 = vcmask 621568   ;;  %vm63_vm8 = vcmask 752640   ;;  %vm71_vm9 = vcmask 15360   ;;  %vm65_vm10 = vcmask 777216   ;;  %s218_s17 = smov 24  }
   0x9   :  { %vm73_vm11 = vcmask 39936   ;;  %vm67_vm12 = vcmask 908288   ;;  %vm69_vm13 = vcmask 932864   ;;  %v48_v18 = vsel %vm47_vm0, %v23_v1, 0.0  ;;  %s219_s18 = smov [#allocation5]   ;;  %s138_s22 = sshll.u32 %s267_s1, 4  ;;  %s139_s22 = int_to_ptr.hbm [resolvable:$true] %s138_s22 }
   0xa   :  { %vm75_vm14 = vcmask 171008   ;;  %vm120_vm15 = vcmask 195584   ;;  %s136_s19 = sshll.u32 %s219_s18, 4  ;;  %vm125_vm0 = vcmask 392192   ;;  %s137_s19 = int_to_ptr.vmem [resolvable:$true] %s136_s19 }
   0xe   :  { %81 = vrot.lane.b32.xlu0 %v24_v0, %s214_s14  ;;  %87 = vrot.lane.b32.xlu1 %v24_v0, %s215_s15 }
   0xf   :  { %93 = vrot.lane.b32.xlu2 %v24_v0, %s216_s16 }
  0x16   :  { %96 = vrot.lane.b32.xlu0 %v24_v0, %s217_s0  ;;  %26 = vrot.lane.b32.xlu1 %v23_v1, %s211_s11 }
  0x17   :  { %29 = vrot.lane.b32.xlu2 %v23_v1, %s214_s14 }
  0x1e   :  { %35 = vrot.lane.b32.xlu1 %v23_v1, %s215_s15  ;;  %32 = vrot.lane.b32.xlu0 %v23_v1, %s212_s12 }
  0x1f   :  { %41 = vrot.lane.b32.xlu2 %v23_v1, %s216_s16 }
  0x26   :  { %44 = vrot.lane.b32.xlu1 %v23_v1, %s217_s0  ;;  %38 = vrot.lane.b32.xlu0 %v23_v1, %s213_s13 }
  0x61   :  { %v91_v2 = vpop.permute.xlu2 %90 }
  0x69   :  { %v94_v12 = vpop.permute.xlu2 %93 }
  0x6a   :  { %v111_v17 = vsel %vm71_vm9, %v94_v12, 0.0 }
  0x71   :  { %v30_v28 = vpop.permute.xlu2 %29 }
  0x78   :  { %v79_v3 = vpop.permute.xlu0 %78  ;;  %v85_v4 = vpop.permute.xlu1 %84 }
  0x79   :  { %v100_v6 = vsel %vm49_vm1, %v99_v5, %v79_v3  ;;  %v42_v32 = vpop.permute.xlu2 %41 }
  0x7a   :  { %v101_v7 = vsel %vm51_vm2, %v100_v6, 0.0  ;;  %v72_v33 = vsel %vm71_vm9, %v42_v32, 0.0 }
  0x80   :  { %v82_v8 = vpop.permute.xlu0 %81  ;;  %v88_v9 = vpop.permute.xlu1 %87 }
  0x81   :  { %v102_v10 = vsel %vm53_vm3, %v101_v7, %v82_v8 }
  0x82   :  { %v103_v11 = vsel %vm55_vm4, %v102_v10, 0.0 }
  0x83   :  { %v104_v13 = vsel %vm57_vm5, %v103_v11, %v85_v4 }
  0x84   :  { %v105_v14 = vsel %vm59_vm6, %v104_v13, 0.0 }
  0x85   :  { %v106_v15 = vsel %vm61_vm7, %v105_v14, %v88_v9 }
  0x86   :  { %v107_v16 = vsel %vm63_vm8, %v106_v15, 0.0 }
  0x87   :  { %v108_v19 = vsel %vm65_vm10, %v107_v16, %v91_v2 }
  0x88   :  { %v97_v20 = vpop.permute.xlu0 %96  ;;  %v109_v21 = vsel %vm67_vm12, %v108_v19, 0.0  ;;  %v27_v22 = vpop.permute.xlu1 %26 }
  0x89   :  { %v112_v23 = vsel %vm73_vm11, %v111_v17, %v97_v20  ;;  %v110_v24 = vsel %vm69_vm13, %v109_v21, %v94_v12  ;;  %v50_v25 = vsel %vm49_vm1, %v48_v18, %v27_v22  ;;  %vm129_vm1 = vcmask 859136  }
  0x8a   :  { %116 = vrot.lane.b32.xlu2 %v110_v24, %s218_s17  ;;  %v113_v26 = vsel %vm75_vm14, %v112_v23, 0.0  ;;  %v52_v27 = vsel %vm51_vm2, %v50_v25, 0.0 }
  0x8b   :  { %118 = vrot.lane.b32.xlu0 %v113_v26, %s218_s17  ;;  %v54_v29 = vsel %vm53_vm3, %v52_v27, %v30_v28 }
  0x8c   :  { %v56_v30 = vsel %vm55_vm4, %v54_v29, 0.0 }
  0x90   :  { %v36_v31 = vpop.permute.xlu1 %35  ;;  %v33_v37 = vpop.permute.xlu0 %32 }
  0x91   :  { %v58_v38 = vsel %vm57_vm5, %v56_v30, %v33_v37 }
  0x92   :  { %v60_v39 = vsel %vm59_vm6, %v58_v38, 0.0 }
  0x93   :  { %v62_v40 = vsel %vm61_vm7, %v60_v39, %v36_v31 }
  0x94   :  { %v64_v41 = vsel %vm63_vm8, %v62_v40, 0.0 }
  0x98   :  { %v45_v34 = vpop.permute.xlu1 %44  ;;  %v39_v42 = vpop.permute.xlu0 %38 }
  0x99   :  { %v74_v35 = vsel %vm73_vm11, %v72_v33, %v45_v34  ;;  %v66_v43 = vsel %vm65_vm10, %v64_v41, %v39_v42 }
  0x9a   :  { %v76_v36 = vsel %vm75_vm14, %v74_v35, 0.0  ;;  %v68_v44 = vsel %vm67_vm12, %v66_v43, 0.0 }
  0x9b   :  { %v70_v45 = vsel %vm69_vm13, %v68_v44, %v42_v32 }
  0x9c   :  { %127 = vst [vmem:[#allocation5] sm:$0xff] %v70_v45 }
  0xe4   :  { %v117_v46 = vpop.permute.xlu2 %116 }
  0xe5   :  { %v124_v47 = vsel %vm120_vm15, %v76_v36, %v117_v46 }
  0xe6   :  { %128 = vst [vmem:[#allocation5 + $0x8] sm:$0xff] %v124_v47 }
  0xfd   :  { %v119_v48 = vpop.permute.xlu0 %118 }
  0xfe   :  { %v121_v49 = vsel %vm120_vm15, %v117_v46, %v119_v48 }
  0xff   :  { %v126_v50 = vsel %vm125_vm0, %v121_v49, 0.0 }
 0x100   :  { %130 = vst.msk [vmem:[#allocation5 + $0x10] sm:$0xff] %vm129_vm1, %v126_v50 }
 0x101   :  { %141 = dma.vmem_to_hbm [thread:$0]  %s137_s19, 384, %s139_s22, [#allocation4]  }
 0x102   :  { %208 = dma.done.wait [#allocation4], 384  }
 0x103   :  { %209 = vsyncadd [#allocation4], 4294966912 }
 0x104   :  { %146 = vsyncpa [#allocation3], 1 }
 0x105   :  { %147 = vsyncpa [#allocation4], 1 }

</bundles_post_ra>
